<compile_context>
chip_gen: v5e
topology: v5e:2x2
jax: 0.10.0
libtpu: 0.0.40
codegen_flags: <defaults>
</compile_context>

<pallas_src>
import functools

import jax
import jax.numpy as jnp
from jax import lax
from jax.experimental import pallas as pl
from jax.experimental.pallas import tpu as pltpu


C_PAD = 128  # lane-dense decoder output width; real logits live in [:, :C]


def _round_up(x, m):
    return ((x + m - 1) // m) * m


# ----------------------------------------------------------------------------
# Fused Pallas kernel: conv (per-tap matmuls over shifted activations) + bias
#                      + time-validity mask + ReLU + max-pool + decoder Linear
# ----------------------------------------------------------------------------

def _imdb_cnn_kernel(x_ref, w_ref, bm_ref, dec_w_ref, dec_b_ref, o_ref,
                     *, Kmax, L, TB, N):
    """x: (TB*L + pad, E) bf16, w: (Kmax, E, N) bf16, bm: (L, N) f32,
    dec_w: (N, 128) bf16, dec_b: (1, 128) f32 -> o: (TB, 128) f32."""
    P = TB * L
    # Conv front end as shift-and-add over *activations*: one MXU matmul per
    # tap position against a sublane-shifted view of x (cheap offset), with all
    # branches packed along the lane dim of the per-tap weight slab.
    # bf16 operands, f32 accumulation.
    acc = jnp.dot(x_ref[0:P, :], w_ref[0], preferred_element_type=jnp.float32)
    for k in range(1, Kmax):
        acc = acc + jnp.dot(x_ref[k:k + P, :], w_ref[k],
                            preferred_element_type=jnp.float32)

    # Per-branch bias and valid-time mask are one additive (L, N) table:
    # bias where t < L-K_j+1, -1e30 otherwise.  ReLU clamps invalid entries to
    # 0, which cannot win the (post-ReLU, >= 0) max-pool.
    acc3 = jnp.maximum(acc.reshape(TB, L, N) + bm_ref[...], 0.0)
    pooled = jnp.max(acc3, axis=1)                               # (TB, N)

    # TODO(synk): nn.Dropout treated as identity (inference mode).
    o_ref[...] = (jnp.dot(pooled.astype(jnp.bfloat16), dec_w_ref[...],
                          preferred_element_type=jnp.float32)
                  + dec_b_ref[...])                              # lane-dense (TB, 128)


def imdb_cnn_fused_call(x3p, w_taps, bias_mask, dec_w_pad, dec_b_pad,
                        *, B, L, TB):
    n_tiles, ptile_pad, E = x3p.shape
    Kmax, _, N = w_taps.shape

    kernel = functools.partial(_imdb_cnn_kernel, Kmax=Kmax, L=L, TB=TB, N=N)

    flops = int(2 * B * L * E * N * Kmax + 2 * B * N * C_PAD)
    bytes_accessed = int(x3p.size * x3p.dtype.itemsize
                         + w_taps.size * w_taps.dtype.itemsize
                         + bias_mask.size * 4
                         + dec_w_pad.size * dec_w_pad.dtype.itemsize
                         + dec_b_pad.size * 4
                         + B * C_PAD * 4)

    return pl.pallas_call(
        kernel,
        out_shape=jax.ShapeDtypeStruct((B, C_PAD), jnp.float32),
        grid_spec=pltpu.PrefetchScalarGridSpec(
            num_scalar_prefetch=0,
            grid=(n_tiles,),
            in_specs=[
                pl.BlockSpec((None, ptile_pad, E), lambda i: (i, 0, 0)),  # acts
                pl.BlockSpec((Kmax, E, N), lambda i: (0, 0, 0)),   # per-tap weights
                pl.BlockSpec((L, N), lambda i: (0, 0)),            # bias/valid-time
                pl.BlockSpec((N, C_PAD), lambda i: (0, 0)),        # decoder weight
                pl.BlockSpec((1, C_PAD), lambda i: (0, 0)),        # decoder bias
            ],
            out_specs=pl.BlockSpec((TB, C_PAD), lambda i: (i, 0)),
        ),
        compiler_params=pltpu.CompilerParams(
            dimension_semantics=("parallel",),
            # v5e's scoped default is only 16 MiB; 32 MiB is safe on all gens.
            # For real shapes, re-derive TB per generation (halve on v7x's
            # 64 MiB VMEM) and keep >= 2 grid steps so both v7x cores engage.
            vmem_limit_bytes=32 * 1024 * 1024),
        cost_estimate=pl.CostEstimate(flops=flops, transcendentals=0,
                                      bytes_accessed=bytes_accessed),
    )(x3p, w_taps, bias_mask, dec_w_pad, dec_b_pad)


# ----------------------------------------------------------------------------
# Parameter init (PyTorch layouts) + packing into the fused-kernel layout
# ----------------------------------------------------------------------------

def init_params(key, V, E, F, Ks, C):
    keys = jax.random.split(key, 1 + 2 * len(Ks) + 2)
    it = iter(keys)

    # nn.Embedding(V, E, padding_idx=0): N(0, 1), row 0 zeroed.  Stored bf16 so
    # the XLA gather emits bf16 MXU operands directly (no separate cast pass).
    emb = jax.random.normal(next(it), (V, E), jnp.float32)
    emb = emb.at[0].set(0.0).astype(jnp.bfloat16)

    conv_ws, conv_bs = [], []
    for K in Ks:
        fan_in = 1 * K * E
        bound = 1.0 / float(fan_in) ** 0.5
        # PyTorch Conv2d weight (F, 1, K, E) with the in-channel squeezed.
        conv_ws.append(jax.random.uniform(next(it), (F, K, E), jnp.float32,
                                          -bound, bound))
        conv_bs.append(jax.random.uniform(next(it), (F,), jnp.float32,
                                          -bound, bound))

    D = len(Ks) * F
    bound = 1.0 / float(D) ** 0.5
    dec_w = jax.random.uniform(next(it), (C, D), jnp.float32, -bound, bound)
    dec_b = jax.random.uniform(next(it), (C,), jnp.float32, -bound, bound)

    return dict(embedding=emb, conv_ws=conv_ws, conv_bs=conv_bs,
                dec_w=dec_w, dec_b=dec_b, kernel_sizes=tuple(Ks))


def pack_params(params, L):
    """Pack conv weights per TAP position (Kmax, E, len(Ks)*F), build the
    additive bias / valid-time table (L, N), and zero-pad the decoder to a
    lane-dense (N, 128) / (1, 128)."""
    Ks = params["kernel_sizes"]
    F = params["conv_ws"][0].shape[0]
    E = params["conv_ws"][0].shape[2]
    C = params["dec_w"].shape[0]
    Kmax = max(Ks)
    N = len(Ks) * F
    assert C <= C_PAD

    # w_taps[k, :, j*F+f] = conv_ws[j][f, k, :]; zero columns for k >= K_j.
    w_taps = jnp.zeros((Kmax, E, N), jnp.float32)
    for j, (K, w) in enumerate(zip(Ks, params["conv_ws"])):
        for k in range(K):
            w_taps = w_taps.at[k, :, j * F:(j + 1) * F].set(w[:, k, :].T)
    w_taps = w_taps.astype(jnp.bfloat16)

    # Additive bias / time-validity table: bias where t < L-K_j+1, -1e30 else.
    bias_mask = jnp.full((L, N), -1e30, jnp.float32)
    for j, (K, b) in enumerate(zip(Ks, params["conv_bs"])):
        T = L - K + 1
        bias_mask = bias_mask.at[:T, j * F:(j + 1) * F].set(
            jnp.broadcast_to(b[None, :], (T, F)))

    # Decoder, zero-padded to 128 output lanes; bf16 weight for the MXU.
    dec_w_pad = jnp.zeros((N, C_PAD), jnp.float32)
    dec_w_pad = dec_w_pad.at[:, :C].set(params["dec_w"].T).astype(jnp.bfloat16)
    dec_b_pad = jnp.zeros((1, C_PAD), jnp.float32).at[:, :C].set(
        params["dec_b"][None, :])
    return w_taps, bias_mask, dec_w_pad, dec_b_pad


# ----------------------------------------------------------------------------
# Forward + plain-JAX reference
# ----------------------------------------------------------------------------

def imdb_cnn_forward(params, tokens, x_len=None, block_b=None):
    del x_len  # unused, parity with the PyTorch forward(x, x_len)
    B, L = tokens.shape
    E = params["embedding"].shape[1]
    Ks = params["kernel_sizes"]
    Kmax = max(Ks)
    C = params["dec_w"].shape[0]

    TB = B if block_b is None else block_b
    assert B % TB == 0 and (TB == B or TB % 8 == 0), \
        "batch tile must divide B and respect (8,128) tiling"
    n_tiles = B // TB

    # Embedding gather stays in XLA glue (bf16 table -> bf16 activations).
    # TODO(synk): fuse via PrefetchScalarGridSpec(num_scalar_prefetch=1) +
    # per-row DMA from an HBM-resident table to kill the (B, L, E) round trip.
    emb = params["embedding"][tokens]                           # (B, L, E) bf16

    # Flatten per batch tile and append >= Kmax-1 zero pad rows so the in-kernel
    # sublane-shifted tap reads never run off the block (padded rows only feed
    # time steps that the bias/validity table masks out).
    ptile = TB * L
    ptile_pad = _round_up(ptile + Kmax - 1, 8)
    x3 = emb.reshape(n_tiles, ptile, E)
    x3p = jnp.concatenate(
        [x3, jnp.zeros((n_tiles, ptile_pad - ptile, E), jnp.bfloat16)], axis=1)

    w_taps, bias_mask, dec_w_pad, dec_b_pad = pack_params(params, L)
    logits_pad = imdb_cnn_fused_call(x3p, w_taps, bias_mask, dec_w_pad,
                                     dec_b_pad, B=B, L=L, TB=TB)
    return logits_pad[:, :C]                                     # lane-dense store, slice here


def ref_forward(params, tokens):
    """Plain-JAX reference with matching numerics (bf16 matmul operands, f32
    accumulation, bf16-rounded pooled features) for a self-check."""
    emb = params["embedding"][tokens].astype(jnp.float32)        # table is bf16
    B, L, _ = emb.shape
    F = params["conv_ws"][0].shape[0]
    feats = []
    for K, w, b in zip(params["kernel_sizes"], params["conv_ws"],
                       params["conv_bs"]):
        w32 = w.astype(jnp.bfloat16).astype(jnp.float32)         # (F, K, E)
        T = L - K + 1
        s = jnp.zeros((B, T, F), jnp.float32)
        for k in range(K):
            s = s + jnp.einsum("bte,fe->btf", emb[:, k:k + T, :], w32[:, k, :],
                               precision=lax.Precision.HIGHEST)
        s = jnp.maximum(s + b, 0.0)
        feats.append(jnp.max(s, axis=1))
    feat = jnp.concatenate(feats, axis=1)
    feat = feat.astype(jnp.bfloat16).astype(jnp.float32)         # mirror kernel
    dw = params["dec_w"].astype(jnp.bfloat16).astype(jnp.float32)
    return (jnp.dot(feat, dw.T, precision=lax.Precision.HIGHEST)
            + params["dec_b"][None, :])


if __name__ == "__main__":
    # Small shapes consistent with the module's forward().
    B, L = 2, 16           # batch, sequence length
    V, E = 50, 32          # vocab_size, embedding_dim
    F = 8                  # kernel_num (ConvOut)
    Ks = (3, 4, 5)         # kernel_sizes
    C = 2                  # class_num

    root = jax.random.PRNGKey(0)
    k_params, k_tok = jax.random.split(root)
    params = init_params(k_params, V, E, F, Ks, C)
    tokens = jax.random.randint(k_tok, (B, L), 0, V, dtype=jnp.int32)
    x_len = jnp.full((B,), L, dtype=jnp.int32)  # unused by forward, kept for parity

    logits = jax.block_until_ready(imdb_cnn_forward(params, tokens, x_len))
    ref = jax.block_until_ready(ref_forward(params, tokens))

    assert logits.shape == (B, C)
    assert jnp.allclose(logits, ref, atol=2e-2, rtol=2e-2), (logits, ref)

    print("KERNEL_OK")
</pallas_src>

<mosaic_0001>
module attributes {stable_mosaic.version = 11 : i64} {
  func.func @_imdb_cnn_kernel(%arg0: i32, %arg1: memref<1x40x32xbf16, #tpu.memory_space<vmem>>, %arg2: memref<5x32x24xbf16, #tpu.memory_space<vmem>>, %arg3: memref<16x24xf32, #tpu.memory_space<vmem>>, %arg4: memref<24x128xbf16, #tpu.memory_space<vmem>>, %arg5: memref<1x128xf32, #tpu.memory_space<vmem>>, %arg6: memref<2x128xf32, #tpu.memory_space<vmem>>) attributes {dimension_semantics = [#tpu.dimension_semantics<parallel>], iteration_bounds = array<i64: 1>, scalar_prefetch = 0 : i64, scratch_operands = 0 : i64, tpu.core_type = #tpu.core_type<tc>, window_params = [{transform_indices = @transform_0, window_bounds = array<i64: 1, 40, 32>}, {pipeline_mode = #tpu.pipeline_mode<synchronous>, transform_indices = @transform_1, window_bounds = array<i64: 5, 32, 24>}, {pipeline_mode = #tpu.pipeline_mode<synchronous>, transform_indices = @transform_2, window_bounds = array<i64: 16, 24>}, {pipeline_mode = #tpu.pipeline_mode<synchronous>, transform_indices = @transform_3, window_bounds = array<i64: 24, 128>}, {pipeline_mode = #tpu.pipeline_mode<synchronous>, transform_indices = @transform_4, window_bounds = array<i64: 1, 128>}, {transform_indices = @transform_5, window_bounds = array<i64: 2, 128>}]} {
    %c0 = arith.constant 0 : index
    %c0_0 = arith.constant 0 : index
    %c0_1 = arith.constant 0 : index
    %0 = vector.load %arg1[%c0, %c0_0, %c0_1] : memref<1x40x32xbf16, #tpu.memory_space<vmem>>, vector<1x32x32xbf16>
    %1 = vector.shape_cast %0 : vector<1x32x32xbf16> to vector<32x32xbf16>
    %c0_2 = arith.constant 0 : index
    %c0_3 = arith.constant 0 : index
    %c0_4 = arith.constant 0 : index
    %2 = vector.load %arg2[%c0_2, %c0_3, %c0_4] : memref<5x32x24xbf16, #tpu.memory_space<vmem>>, vector<1x32x24xbf16>
    %3 = vector.shape_cast %2 : vector<1x32x24xbf16> to vector<32x24xbf16>
    %cst = arith.constant dense<0.000000e+00> : vector<32x24xf32>
    %4 = tpu.matmul %1, %3, %cst {dimension_numbers = #tpu.dot_dimension_numbers<[1], [0], [0], [1], [0, 0, 1, 1], [], []>} : vector<32x32xbf16>, vector<32x24xbf16>, vector<32x24xf32> -> vector<32x24xf32>
    %c0_5 = arith.constant 0 : index
    %c1 = arith.constant 1 : index
    %c0_6 = arith.constant 0 : index
    %5 = vector.load %arg1[%c0_5, %c1, %c0_6] : memref<1x40x32xbf16, #tpu.memory_space<vmem>>, vector<1x32x32xbf16>
    %6 = vector.shape_cast %5 : vector<1x32x32xbf16> to vector<32x32xbf16>
    %c1_7 = arith.constant 1 : index
    %c0_8 = arith.constant 0 : index
    %c0_9 = arith.constant 0 : index
    %7 = vector.load %arg2[%c1_7, %c0_8, %c0_9] : memref<5x32x24xbf16, #tpu.memory_space<vmem>>, vector<1x32x24xbf16>
    %8 = vector.shape_cast %7 : vector<1x32x24xbf16> to vector<32x24xbf16>
    %cst_10 = arith.constant dense<0.000000e+00> : vector<32x24xf32>
    %9 = tpu.matmul %6, %8, %cst_10 {dimension_numbers = #tpu.dot_dimension_numbers<[1], [0], [0], [1], [0, 0, 1, 1], [], []>} : vector<32x32xbf16>, vector<32x24xbf16>, vector<32x24xf32> -> vector<32x24xf32>
    %10 = arith.addf %4, %9 : vector<32x24xf32>
    %c0_11 = arith.constant 0 : index
    %c2 = arith.constant 2 : index
    %c0_12 = arith.constant 0 : index
    %11 = vector.load %arg1[%c0_11, %c2, %c0_12] : memref<1x40x32xbf16, #tpu.memory_space<vmem>>, vector<1x32x32xbf16>
    %12 = vector.shape_cast %11 : vector<1x32x32xbf16> to vector<32x32xbf16>
    %c2_13 = arith.constant 2 : index
    %c0_14 = arith.constant 0 : index
    %c0_15 = arith.constant 0 : index
    %13 = vector.load %arg2[%c2_13, %c0_14, %c0_15] : memref<5x32x24xbf16, #tpu.memory_space<vmem>>, vector<1x32x24xbf16>
    %14 = vector.shape_cast %13 : vector<1x32x24xbf16> to vector<32x24xbf16>
    %cst_16 = arith.constant dense<0.000000e+00> : vector<32x24xf32>
    %15 = tpu.matmul %12, %14, %cst_16 {dimension_numbers = #tpu.dot_dimension_numbers<[1], [0], [0], [1], [0, 0, 1, 1], [], []>} : vector<32x32xbf16>, vector<32x24xbf16>, vector<32x24xf32> -> vector<32x24xf32>
    %16 = arith.addf %10, %15 : vector<32x24xf32>
    %c0_17 = arith.constant 0 : index
    %c3 = arith.constant 3 : index
    %c0_18 = arith.constant 0 : index
    %17 = vector.load %arg1[%c0_17, %c3, %c0_18] : memref<1x40x32xbf16, #tpu.memory_space<vmem>>, vector<1x32x32xbf16>
    %18 = vector.shape_cast %17 : vector<1x32x32xbf16> to vector<32x32xbf16>
    %c3_19 = arith.constant 3 : index
    %c0_20 = arith.constant 0 : index
    %c0_21 = arith.constant 0 : index
    %19 = vector.load %arg2[%c3_19, %c0_20, %c0_21] : memref<5x32x24xbf16, #tpu.memory_space<vmem>>, vector<1x32x24xbf16>
    %20 = vector.shape_cast %19 : vector<1x32x24xbf16> to vector<32x24xbf16>
    %cst_22 = arith.constant dense<0.000000e+00> : vector<32x24xf32>
    %21 = tpu.matmul %18, %20, %cst_22 {dimension_numbers = #tpu.dot_dimension_numbers<[1], [0], [0], [1], [0, 0, 1, 1], [], []>} : vector<32x32xbf16>, vector<32x24xbf16>, vector<32x24xf32> -> vector<32x24xf32>
    %22 = arith.addf %16, %21 : vector<32x24xf32>
    %c0_23 = arith.constant 0 : index
    %c4 = arith.constant 4 : index
    %c0_24 = arith.constant 0 : index
    %23 = vector.load %arg1[%c0_23, %c4, %c0_24] : memref<1x40x32xbf16, #tpu.memory_space<vmem>>, vector<1x32x32xbf16>
    %24 = vector.shape_cast %23 : vector<1x32x32xbf16> to vector<32x32xbf16>
    %c4_25 = arith.constant 4 : index
    %c0_26 = arith.constant 0 : index
    %c0_27 = arith.constant 0 : index
    %25 = vector.load %arg2[%c4_25, %c0_26, %c0_27] : memref<5x32x24xbf16, #tpu.memory_space<vmem>>, vector<1x32x24xbf16>
    %26 = vector.shape_cast %25 : vector<1x32x24xbf16> to vector<32x24xbf16>
    %cst_28 = arith.constant dense<0.000000e+00> : vector<32x24xf32>
    %27 = tpu.matmul %24, %26, %cst_28 {dimension_numbers = #tpu.dot_dimension_numbers<[1], [0], [0], [1], [0, 0, 1, 1], [], []>} : vector<32x32xbf16>, vector<32x24xbf16>, vector<32x24xf32> -> vector<32x24xf32>
    %28 = arith.addf %22, %27 : vector<32x24xf32>
    %29 = vector.shape_cast %28 : vector<32x24xf32> to vector<2x16x24xf32>
    %c0_29 = arith.constant 0 : index
    %c0_30 = arith.constant 0 : index
    %30 = vector.load %arg3[%c0_29, %c0_30] : memref<16x24xf32, #tpu.memory_space<vmem>>, vector<16x24xf32>
    %31 = vector.shape_cast %30 : vector<16x24xf32> to vector<1x16x24xf32>
    %32 = vector.broadcast %31 : vector<1x16x24xf32> to vector<2x16x24xf32>
    %33 = arith.addf %29, %32 : vector<2x16x24xf32>
    %cst_31 = arith.constant 0.000000e+00 : f32
    %34 = vector.broadcast %cst_31 : f32 to vector<2x16x24xf32>
    %35 = arith.maximumf %33, %34 : vector<2x16x24xf32>
    %cst_32 = arith.constant dense<0xFF800000> : vector<2x24xf32>
    %36 = vector.multi_reduction <maximumf>, %35, %cst_32 [1] : vector<2x16x24xf32> to vector<2x24xf32>
    %37 = arith.truncf %36 : vector<2x24xf32> to vector<2x24xbf16>
    %c0_33 = arith.constant 0 : index
    %c0_34 = arith.constant 0 : index
    %38 = vector.load %arg4[%c0_33, %c0_34] : memref<24x128xbf16, #tpu.memory_space<vmem>>, vector<24x128xbf16>
    %cst_35 = arith.constant dense<0.000000e+00> : vector<2x128xf32>
    %39 = tpu.matmul %37, %38, %cst_35 {dimension_numbers = #tpu.dot_dimension_numbers<[1], [0], [0], [1], [0, 0, 1, 1], [], []>} : vector<2x24xbf16>, vector<24x128xbf16>, vector<2x128xf32> -> vector<2x128xf32>
    %c0_36 = arith.constant 0 : index
    %c0_37 = arith.constant 0 : index
    %40 = vector.load %arg5[%c0_36, %c0_37] : memref<1x128xf32, #tpu.memory_space<vmem>>, vector<1x128xf32>
    %41 = vector.broadcast %40 : vector<1x128xf32> to vector<2x128xf32>
    %42 = arith.addf %39, %41 : vector<2x128xf32>
    %c0_38 = arith.constant 0 : index
    %c0_39 = arith.constant 0 : index
    %43 = vector.load %arg6[%c0_38, %c0_39] : memref<2x128xf32, #tpu.memory_space<vmem>>, vector<2x128xf32>
    tpu.vector_store %arg6[%c0_38, %c0_39], %42 {strides = array<i32>} : memref<2x128xf32, #tpu.memory_space<vmem>>, vector<2x128xf32>,
    return
  }
  func.func @transform_0(%arg0: i32) -> (i32, i32, i32) {
    %c0_i32 = arith.constant 0 : i32
    %c0_i32_0 = arith.constant 0 : i32
    %c0_i32_1 = arith.constant 0 : i32
    return %arg0, %c0_i32, %c0_i32_0 : i32, i32, i32
  }
  func.func @transform_1(%arg0: i32) -> (i32, i32, i32) {
    %c0_i32 = arith.constant 0 : i32
    %c0_i32_0 = arith.constant 0 : i32
    %c0_i32_1 = arith.constant 0 : i32
    %c0_i32_2 = arith.constant 0 : i32
    return %c0_i32, %c0_i32_0, %c0_i32_1 : i32, i32, i32
  }
  func.func @transform_2(%arg0: i32) -> (i32, i32) {
    %c0_i32 = arith.constant 0 : i32
    %c0_i32_0 = arith.constant 0 : i32
    %c0_i32_1 = arith.constant 0 : i32
    return %c0_i32, %c0_i32_0 : i32, i32
  }
  func.func @transform_3(%arg0: i32) -> (i32, i32) {
    %c0_i32 = arith.constant 0 : i32
    %c0_i32_0 = arith.constant 0 : i32
    %c0_i32_1 = arith.constant 0 : i32
    return %c0_i32, %c0_i32_0 : i32, i32
  }
  func.func @transform_4(%arg0: i32) -> (i32, i32) {
    %c0_i32 = arith.constant 0 : i32
    %c0_i32_0 = arith.constant 0 : i32
    %c0_i32_1 = arith.constant 0 : i32
    return %c0_i32, %c0_i32_0 : i32, i32
  }
  func.func @transform_5(%arg0: i32) -> (i32, i32) {
    %c0_i32 = arith.constant 0 : i32
    %c0_i32_0 = arith.constant 0 : i32
    return %arg0, %c0_i32 : i32, i32
  }
}

</mosaic_0001>

<bundles_post_ra>
// kernel: tpu_custom_call.1
= control target key start
LH: loop header
LB: loop body
LE: loop exit
PB: predicated region body
PF: predicated region fallthrough
CT: control target
= control target key end

     0   :  { %vm82_vm0 = vcmask 261120   ;;  %vm49_vm1 = vsmask.f32 7424  ;;  %s666_s0 = inlined_call_operand.vmem [shape: bf16[1,40,32], index: 0, kind: input, shape index: {}]   ;;  %s667_s1 = inlined_call_operand.vmem [shape: bf16[5,32,24], index: 1, kind: input, shape index: {}]   ;;  %s668_s2 = inlined_call_operand.vmem [shape: f32[16,24], index: 2, kind: input, shape index: {}]   ;;  %s669_s3 = inlined_call_operand.vmem [shape: bf16[24,128], index: 3, kind: input, shape index: {}]   ;;  %s670_s4 = inlined_call_operand.vmem [shape: f32[1,128], index: 4, kind: input, shape index: {}]   ;;  %s671_s5 = inlined_call_operand.hbm [shape: f32[2,128], index: 5, kind: output, shape index: {}]  }
   0x1   :  { %v497_v0 = vld [vmem:[%s667_s1 + $0x18] sm:$0xff]  ;;  %v495_v1 = vld [vmem:[%s667_s1 + $0x8] sm:$0xff]  ;;  %v496_v2 = vld [vmem:[%s667_s1 + $0x10] sm:$0xff] }
   0x2   :  { %v582_v3 = vld [vmem:[%s666_s0 + $0x8] sm:$0xff]  ;;  %v30_v4 = vld [vmem:[%s666_s0 + $0x10] sm:$0x1]  ;;  %509 = vmatpush.bf16.msra.mxu2 %v497_v0  ;;  %130 = vmatpush.bf16.msra.mxu1 %v495_v1  ;;  %v494_v5 = vld [vmem:[%s667_s1] sm:$0xff] }
   0x3   :  { %v45_v6 = vunpack.c.l.b16 %v30_v4  ;;  %v506_v7 = vld [vmem:[%s666_s0] sm:$0xff]   ;;  %95 = vmatpush.bf16.msra.mxu0 %v497_v0  ;;  %v58_v9 = vshll.u32 %v582_v3, 16  ;;  %v62_v10 = vshrl.u32 %v582_v3, 16  ;;  %v499_v12 = vld [vmem:[%s667_s1 + $0x28] sm:$0xff]  ;;  %v501_v13 = vld [vmem:[%s667_s1 + $0x38] sm:$0xff] }
   0x4   :  { %v143_v8 = vld [vmem:[%s666_s0] sm:$0xe]  ;;  %v508_v11 = vunpack.c.h.b16 %v506_v7  ;;  %v51_v15 = vshrl.u32 %v506_v7, 16  ;;  %v53_v16 = vshll.u32 %v506_v7, 16  ;;  %v503_v18 = vld [vmem:[%s667_s1 + $0x48] sm:$0xff]  ;;  %254 = vmatpush.bf16.msra.mxu3 %v501_v13  ;;  %v500_v20 = vld [vmem:[%s667_s1 + $0x30] sm:$0xff] }
   0x5   :  { %v604_v14 = vpack.c.b16 %v45_v6, %v45_v6  ;;  %v150_v17 = vunpack.c.l.b16 %v143_v8  ;;  %v60_v19 = vrot.slane %v58_v9, 1  ;;  %v217_v21 = vrot.slane %v62_v10, 1  ;;  %v199_v23 = vld [vmem:[%s666_s0 + $0x10] sm:$0x3] }
   0x6   :  { %v218_v22 = vrot.slane %v58_v9, 2  ;;  %510 = vmatpush.bf16.msra.mxu2 %v496_v2  ;;  %131 = vmatpush.bf16.msra.mxu1 %v494_v5  ;;  %v55_v25 = vrot.slane %v53_v16, 1  ;;  %v206_v28 = vunpack.c.l.b16 %v199_v23 }
   0x7   :  { %v66_v24 = vshll.u32 %v604_v14, 16  ;;  %v151_v26 = vpack.c.b16 %v508_v11, %v150_v17  ;;  %96 = vmatpush.bf16.msra.mxu0 %v496_v2  ;;  %v64_v27 = vor.u32 %v62_v10, %v60_v19 }
   0xa   :  { %182 = vmatpush.bf16.msrb.mxu2 %v499_v12 }
   0xb   :  { %10 = vsyncpa [#allocation3], 0  ;;  %v68_v29 = vrot.slane %v66_v24, 1  ;;  %v56_v30 = vor.u32 %v55_v25, %v51_v15  ;;  %v498_v31 = vld [vmem:[%s667_s1 + $0x20] sm:$0xff]  ;;  %v210_v32 = vshrl.u32 %v151_v26, 16  ;;  %v213_v33 = vshll.u32 %v151_v26, 16  ;;  %310 = vmatpush.bf16.msrb.mxu0 %v503_v18  ;;  %444 = vmatmul.msk.bf16.vlgmr.msra.gmra.mxu1 %vm82_vm0, %v506_v7 }
   0xc   :  { %v502_v34 = vld [vmem:[%s667_s1 + $0x40] sm:$0xff]  ;;  %255 = vmatpush.bf16.msra.mxu3 %v500_v20  ;;  %v219_v35 = vor.u32 %v218_v22, %v217_v21  ;;  %vm208_vm2 = vsmask.f32 6400  ;;  %v207_v43 = vpack.c.b16 %v206_v28, %v206_v28  ;;  %v154_v48 = vrot.slane %v582_v3, 1  ;;  %v360_v9 = vld [vmem:[%s669_s3 + $0x8] sm:$0xf] }
   0xd   :  { %v271_v36 = vld [vmem:[%s666_s0] sm:$0xc]  ;;  %v69_v37 = vsel %vm49_vm1, %v64_v27, %v68_v29  ;;  %v61_v38 = vsel %vm49_vm1, %v56_v30, %v60_v19  ;;  %v212_v39 = vrot.slane %v210_v32, 1  ;;  %v215_v40 = vrot.slane %v213_v33, 2  ;;  %v328_v25 = vld [vmem:[%s668_s2 + $0x8] sm:$0xff]  ;;  %s539_s6 = smov [#allocation2]  }
   0xe   :  { %435 = vmatmul.msk.bf16.vlgmr.msra.gmra.mxu2 %vm82_vm0, %v69_v37  ;;  %434 = vmatmul.msk.bf16.vlgmr.msra.gmra.mxu0 %vm82_vm0, %v61_v38  ;;  %v278_v42 = vunpack.c.l.b16 %v271_v36  ;;  %v222_v46 = vshrl.u32 %v207_v43, 16  ;;  %v225_v47 = vshll.u32 %v207_v43, 16  ;;  %v282_v49 = vrot.slane %v582_v3, 2  ;;  %v504_v17 = vld [vmem:[%s669_s3] sm:$0xff]  ;;  %s407_s7 = sshll.u32 %s539_s6, 4  ;;  %s409_s10 = sshll.u32 %s671_s5, 4  ;;  %s408_s7 = int_to_ptr.vmem [resolvable:$true] %s407_s7  ;;  %s410_s10 = int_to_ptr.hbm [resolvable:$true] %s409_s10 }
   0xf   :  { %183 = vmatpush.bf16.msrb.mxu2 %v498_v31  ;;  %v216_v41 = vor.u32 %v215_v40, %v212_v39  ;;  %311 = vmatpush.bf16.msrb.mxu0 %v502_v34  ;;  %v153_v50 = vrot.slane %v151_v26, 1  ;;  %vm152_vm3 = vcmask 1046528   ;;  %vm280_vm4 = vcmask 1045504   ;;  %v327_v18 = vld [vmem:[%s668_s2] sm:$0xff] }
  0x10   :  { %v279_v45 = vpack.c.b16 %v508_v11, %v278_v42  ;;  %v224_v52 = vrot.slane %v222_v46, 1  ;;  %v227_v53 = vrot.slane %v225_v47, 2  ;;  %v156_v58 = vrot.slane %v604_v14, 1 }
  0x11   :  { %v220_v44 = vsel %vm208_vm2, %v216_v41, %v219_v35  ;;  %v155_v54 = vsel %vm152_vm3, %v153_v50, %v154_v48  ;;  %v284_v59 = vrot.slane %v207_v43, 2  ;;  %v377_v10 = vunpack.c.l.b16 %v360_v9  ;;  %v512_v9 = vld [vmem:[%s670_s4] ss:$0 sm:$0xff] }
  0x12   :  { %472 = vmatmul.msk.bf16.vlgmr.msra.gmra.mxu3 %vm82_vm0, %v220_v44  ;;  %v281_v51 = vrot.slane %v279_v45, 2  ;;  %v228_v56 = vor.u32 %v227_v53, %v224_v52  ;;  %v157_v60 = vsel %vm152_vm3, %v154_v48, %v156_v58  ;;  %vm384_vm5 = vcmask 1043456  }
  0x13   :  { %v285_v61 = vsel %vm280_vm4, %v282_v49, %v284_v59  ;;  %v379_v12 = vpack.c.b16 %v377_v10, %v377_v10  ;;  %vm337_vm6 = vcmask 195584   ;;  %vm369_vm7 = vcmask 1041409  }
  0x14   :  { %v283_v55 = vsel %vm280_vm4, %v281_v51, %v282_v49  ;;  %v229_v57 = vsel %vm208_vm2, %v219_v35, %v228_v56 }
  0x15   :  { %v386_v14 = vsel %vm384_vm5, %v379_v12, 0 }
  0x16   :  { %394 = vmatpush.bf16.msrb.mxu1 %v386_v14 }
  0x1a   :  { %395 = vmatpush.bf16.msrb.mxu1 %v504_v17 }
  0x1b   :  { %445 = vmatmul.msk.bf16.gmra.mxu1 %vm82_vm0, %v582_v3 }
  0x1e   :  { %458 = vmatmul.msk.bf16.vlgmr.msrb.gmra.mxu2 %vm82_vm0, %v155_v54  ;;  %486 = vmatmul.msk.bf16.vlgmr.msrb.gmra.mxu0 %vm82_vm0, %v283_v55 }
  0x22   :  { %473 = vmatmul.msk.bf16.gmra.mxu3 %vm82_vm0, %v229_v57 }
  0x2e   :  { %459 = vmatmul.msk.bf16.gmra.mxu2 %vm82_vm0, %v157_v60  ;;  %487 = vmatmul.msk.bf16.gmra.mxu0 %vm82_vm0, %v285_v61 }
  0x88   :  { %v133_v1 = vpop.f32.mrf.mxu1 }
  0x8b   :  { %v98_v62 = vpop.f32.mrf.mxu0 }
  0x8c   :  { %v134_v5 = vadd.f32 %v133_v1, %v98_v62 }
  0x90   :  { %v135_v6 = vpop.f32.mrf.mxu1 }
  0x91   :  { %v103_v63 = vpop.f32.mrf.mxu2 }
  0x93   :  { %v100_v0 = vpop.f32.mrf.mxu0 }
  0x94   :  { %v136_v15 = vadd.f32 %v135_v6, %v100_v0 }
  0x95   :  { %v257_v3 = vpop.f32.mrf.mxu3 }
  0x98   :  { %v138_v22 = vpop.f32.mrf.mxu1 }
  0x99   :  { %v105_v2 = vpop.f32.mrf.mxu2  ;;  %v139_v27 = vadd.f32 %v138_v22, %v103_v63 }
  0x9b   :  { %v313_v4 = vpop.f32.mrf.mxu0 }
  0x9d   :  { %v259_v13 = vpop.f32.mrf.mxu3 }
  0xa0   :  { %v140_v38 = vpop.f32.mrf.mxu1 }
  0xa1   :  { %v185_v7 = vpop.f32.mrf.mxu2  ;;  %v141_v40 = vadd.f32 %v140_v38, %v105_v2 }
  0xa2   :  { %v195_v8 = vadd.f32 %v185_v7, %v134_v5 }
  0xa3   :  { %v315_v19 = vpop.f32.mrf.mxu0 }
  0xa4   :  { %v267_v11 = vadd.f32 %v257_v3, %v195_v8 }
  0xa5   :  { %v262_v30 = vpop.f32.mrf.mxu3 }
  0xa6   :  { %v323_v16 = vadd.f32 %v313_v4, %v267_v11 }
  0xa8   :  { %v329_v23 = vadd.f32 %v327_v18, %v323_v16 }
  0xa9   :  { %v187_v20 = vpop.f32.mrf.mxu2 }
  0xaa   :  { %v196_v21 = vadd.f32 %v187_v20, %v136_v15  ;;  %v333_v28 = vmax.f32 %v329_v23, 0.0 }
  0xab   :  { %v318_v34 = vpop.f32.mrf.mxu0 }
  0xac   :  { %v268_v24 = vadd.f32 %v259_v13, %v196_v21  ;;  %v338_v36 = vsel %vm337_vm6, %v333_v28, -inf }
  0xad   :  { %v264_v45 = vpop.f32.mrf.mxu3 }
  0xae   :  { %v324_v26 = vadd.f32 %v315_v19, %v268_v24 }
  0xb0   :  { %v330_v29 = vadd.f32 %v328_v25, %v324_v26 }
  0xb1   :  { %v190_v31 = vpop.f32.mrf.mxu2 }
  0xb2   :  { %v334_v32 = vmax.f32 %v330_v29, 0.0  ;;  %v197_v33 = vadd.f32 %v190_v31, %v139_v27 }
  0xb3   :  { %v320_v48 = vpop.f32.mrf.mxu0 }
  0xb4   :  { %v269_v35 = vadd.f32 %v262_v30, %v197_v33  ;;  %v339_v37 = vsel %vm337_vm6, %v334_v32, -inf }
  0xb5   :  { %v340_v39 = vmax.f32 %v338_v36, %v339_v37 }
  0xb6   :  { %v325_v41 = vadd.f32 %v318_v34, %v269_v35 }
  0xb7   :  { %v341_v43 = vrot.slane %v340_v39, 4 }
  0xb8   :  { %v331_v46 = vadd.f32 %v327_v18, %v325_v41 }
  0xb9   :  { %v192_v42 = vpop.f32.mrf.mxu2  ;;  %v342_v49 = vmax.f32 %v340_v39, %v341_v43 }
  0xba   :  { %v198_v44 = vadd.f32 %v192_v42, %v141_v40  ;;  %v335_v51 = vmax.f32 %v331_v46, 0.0 }
  0xbb   :  { %v343_v53 = vrot.slane %v342_v49, 2 }
  0xbc   :  { %v270_v47 = vadd.f32 %v264_v45, %v198_v44  ;;  %v347_v55 = vsel %vm337_vm6, %v335_v51, -inf }
  0xbd   :  { %v344_v57 = vmax.f32 %v342_v49, %v343_v53 }
  0xbe   :  { %v326_v50 = vadd.f32 %v320_v48, %v270_v47 }
  0xbf   :  { %v345_v60 = vrot.slane %v344_v57, 1 }
  0xc0   :  { %v332_v52 = vadd.f32 %v328_v25, %v326_v50 }
  0xc1   :  { %v346_v63 = vmax.f32 %v344_v57, %v345_v60 }
  0xc2   :  { %v336_v54 = vmax.f32 %v332_v52, 0.0 }
  0xc3   :  { %v356_v3 = vpack.c.bf16 %v346_v63, %v346_v63 }
  0xc4   :  { %v348_v56 = vsel %vm337_vm6, %v336_v54, -inf }
  0xc5   :  { %v349_v58 = vmax.f32 %v347_v55, %v348_v56  ;;  %v367_v5 = vunpack.c.l.b16 %v356_v3 }
  0xc7   :  { %v350_v59 = vrot.slane %v349_v58, 4 }
  0xc9   :  { %v351_v61 = vmax.f32 %v349_v58, %v350_v59 }
  0xcb   :  { %v352_v62 = vrot.slane %v351_v61, 2 }
  0xcd   :  { %v353_v0 = vmax.f32 %v351_v61, %v352_v62 }
  0xcf   :  { %v354_v1 = vrot.slane %v353_v0, 1 }
  0xd1   :  { %v355_v2 = vmax.f32 %v353_v0, %v354_v1 }
  0xd3   :  { %v357_v4 = vpack.c.bf16 %v355_v2, %v355_v2 }
  0xd5   :  { %v368_v6 = vunpack.c.l.b16 %v357_v4 }
  0xd7   :  { %v370_v7 = vsel %vm369_vm7, %v368_v6, %v367_v5 }
  0xd8   :  { %v371_v8 = vpack.c.b16 %v370_v7, %v370_v7 }
  0xda   :  { %492 = vmatmul.msk.bf16.vlgmr.msrb.gmra.mxu1 %vm337_vm6, %v371_v8 }
 0x157   :  { %v397_v10 = vpop.f32.mrf.mxu1 }
 0x158   :  { %v398_v11 = vadd.f32 %v512_v9, %v397_v10 }
 0x15a   :  { %401 = vst [vmem:[#allocation2] sm:$0x3] %v398_v11 }
 0x15b   :  { %412 = dma.vmem_to_hbm [thread:$0]  %s408_s7, 32, %s410_s10, [#allocation3]  }
 0x15f   :  { %v399_v12 = vpop.f32.mrf.mxu1 }
 0x160   :  { %537 = dma.done.wait [#allocation3], 32  }
 0x161   :  { %538 = vsyncadd [#allocation3], 4294967264 }
 0x162   :  { %417 = vsyncpa [#allocation3], 1 }

</bundles_post_ra>
